<compile_context>
chip_gen: v6e
topology: v6e:2x2x1
jax: 0.10.0
libtpu: 0.0.40
codegen_flags: <defaults>
</compile_context>

<pallas_src>
import functools

import jax
import jax.numpy as jnp
from jax.experimental import pallas as pl
from jax.experimental.pallas import tpu as pltpu

_BLK = 128  # diagonal block edge == lane width


def _ce_diag_kernel(*args, n, k):
    """args = (k diagonal-block refs, out_ref, acc_ref).

    Accumulates per-lane partial sums of -log(diag + 1e-24) into acc_ref and
    writes the lane-dense per-core partial to out_ref at the last step.
    """
    refs = args[:k]
    out_ref = args[k]          # (1, 1, _BLK) f32, resident per core
    acc_ref = args[k + 1]      # (1, _BLK)    f32 VMEM scratch

    step = pl.program_id(1)
    n_steps = pl.num_programs(1)
    # Global "super-step" index: which group of K diagonal blocks this is.
    sup = pl.program_id(0) * n_steps + step

    @pl.when(step == 0)
    def _init():
        acc_ref[...] = jnp.zeros_like(acc_ref)

    # Diagonal mask for a 128x128 block; built once per step, shared by all
    # K blocks (cheap: 16 vreg compares, hidden under the K DMAs).
    row = jax.lax.broadcasted_iota(jnp.int32, (_BLK, _BLK), 0)
    col = jax.lax.broadcasted_iota(jnp.int32, (_BLK, _BLK), 1)
    dmask = row == col
    lane = jax.lax.broadcasted_iota(jnp.int32, (1, _BLK), 1)

    total = jnp.zeros((1, _BLK), jnp.float32)
    for j in range(k):
        x = refs[j][...]                                        # (128,128) in dtype
        # Lane-dense diagonal: select in the input dtype, sublane-reduce,
        # then cast only the 128-element diagonal to f32.
        d = jnp.sum(jnp.where(dmask, x, jnp.zeros_like(x)),
                    axis=0, keepdims=True)                      # (1,128) in dtype
        d = d.astype(jnp.float32)
        # Global row ids of this block (computed from the *unclamped* logical
        # block index, so clamped overhang blocks are fully masked out).
        gid = (sup * k + j) * _BLK + lane                       # (1,128) int32
        d_safe = jnp.where(gid < n, d, 1.0)                     # select: NaN-safe
        # -log(1.0 + 1e-24) == -0.0 in f32 -> masked lanes contribute nothing.
        total = total - jnp.log(d_safe + 1e-24)
    acc_ref[...] += total

    @pl.when(step == n_steps - 1)
    def _finalize():
        out_ref[...] = acc_ref[...].reshape(1, 1, _BLK)


def cross_entropy_loss(logit: jax.Array, *, blocks_per_step: int = 8) -> jax.Array:
    """Pallas equivalent of CrossEntropyLoss.forward(logit). Returns scalar f32."""
    assert logit.ndim == 2 and logit.shape[0] == logit.shape[1], \
        "logit must be a square [N, N] matrix"
    n = logit.shape[0]

    # Small-N fast path: pallas_call launch overhead dominates, plain XLA wins.
    if n <= 2 * _BLK:
        d = jnp.diag(logit).astype(jnp.float32)
        return jnp.mean(-jnp.log(d + 1e-24))

    nb = pl.cdiv(n, _BLK)                       # number of 128-row diagonal blocks
    k = max(1, min(blocks_per_step, nb))        # diagonal blocks fetched per step
    n_super = pl.cdiv(nb, k)                    # total block-groups to process
    n_cores = 2 if n_super >= 2 else 1          # v7x: split groups across 2 TCs
    steps = pl.cdiv(n_super, n_cores)           # groups per core
    grid = (n_cores, steps)

    def block_index(j):
        def idx(c, i):
            # Logical block for sub-block j of this (core, step); clamp so the
            # DMA stays in-bounds — overhang rows are masked in the kernel.
            b = jnp.minimum((c * steps + i) * k + j, nb - 1)
            return (b, b)
        return idx

    in_specs = [pl.BlockSpec((_BLK, _BLK), block_index(j)) for j in range(k)]

    out = pl.pallas_call(
        functools.partial(_ce_diag_kernel, n=n, k=k),
        out_shape=jax.ShapeDtypeStruct((n_cores, 1, _BLK), jnp.float32),
        grid=grid,
        in_specs=in_specs,                       # same array, K diagonal windows
        out_specs=pl.BlockSpec((1, 1, _BLK), lambda c, i: (c, 0, 0)),
        scratch_shapes=[pltpu.VMEM((1, _BLK), jnp.float32)],
        compiler_params=pltpu.CompilerParams(
            dimension_semantics=("parallel", "arbitrary")),
    )(*([logit] * k))

    # Tiny final reduction (<= 256 lanes) + mean, done by XLA.
    return jnp.sum(out) / jnp.float32(n)


if __name__ == "__main__":
    key = jax.random.PRNGKey(0)
    k0, k1, k2 = jax.random.split(key, 3)

    def ref_loss(x):
        return jnp.mean(-jnp.log(jnp.diag(x).astype(jnp.float32) + 1e-24))

    # 1) The module's typical tiny use-case (N x N similarity matrix): fast path.
    n0 = 16
    x0 = jax.nn.sigmoid(jax.random.normal(k0, (n0, n0), dtype=jnp.float32))
    l0 = cross_entropy_loss(x0)
    jax.block_until_ready(l0)
    assert jnp.allclose(l0, ref_loss(x0), rtol=1e-5, atol=1e-6), (l0, ref_loss(x0))

    # 2) Pallas path: ragged tail (300 = 2*128 + 44), K=2 blocks/step,
    #    two-axis grid with a fully-masked overhang block on core 1.
    n1 = 300
    x1 = jax.nn.sigmoid(jax.random.normal(k1, (n1, n1), dtype=jnp.float32))
    l1 = cross_entropy_loss(x1, blocks_per_step=2)
    jax.block_until_ready(l1)
    assert jnp.allclose(l1, ref_loss(x1), rtol=1e-5, atol=1e-6), (l1, ref_loss(x1))

    # 3) Pallas path: multi-step accumulation per core (nb=9, K=4 -> 3 groups
    #    split over the core axis), exercising the resident accumulator.
    n2 = 1152
    x2 = jax.nn.sigmoid(jax.random.normal(k2, (n2, n2), dtype=jnp.float32))
    l2 = cross_entropy_loss(x2, blocks_per_step=4)
    jax.block_until_ready(l2)
    assert jnp.allclose(l2, ref_loss(x2), rtol=1e-5, atol=1e-6), (l2, ref_loss(x2))

    print("KERNEL_OK")
</pallas_src>

<mosaic_0001>
module attributes {stable_mosaic.version = 11 : i64} {
  func.func @_ce_diag_kernel(%arg0: i32, %arg1: i32, %arg2: memref<128x128xf32, #tpu.memory_space<vmem>>, %arg3: memref<128x128xf32, #tpu.memory_space<vmem>>, %arg4: memref<1x1x128xf32, #tpu.memory_space<vmem>>, %arg5: memref<1x128xf32, #tpu.memory_space<vmem>>) attributes {dimension_semantics = [#tpu.dimension_semantics<parallel>, #tpu.dimension_semantics<arbitrary>], iteration_bounds = array<i64: 2, 1>, scalar_prefetch = 0 : i64, scratch_operands = 1 : i64, tpu.core_type = #tpu.core_type<tc>, window_params = [{transform_indices = @transform_0, window_bounds = array<i64: 128, 128>}, {transform_indices = @transform_1, window_bounds = array<i64: 128, 128>}, {transform_indices = @transform_2, window_bounds = array<i64: 1, 1, 128>}]} {
    %c1_i32 = arith.constant 1 : i32
    %0 = arith.muli %arg0, %c1_i32 : i32
    %1 = arith.addi %0, %arg1 : i32
    %c0_i32 = arith.constant 0 : i32
    %2 = arith.cmpi eq, %arg1, %c0_i32 : i32
    %3 = arith.extui %2 : i1 to i32
    %c0_i32_0 = arith.constant 0 : i32
    %4 = arith.cmpi ne, %3, %c0_i32_0 : i32
    scf.if %4 {
      %cst_23 = arith.constant 0.000000e+00 : f32
      %52 = vector.broadcast %cst_23 : f32 to vector<1x128xf32>
      %c0_24 = arith.constant 0 : index
      %c0_25 = arith.constant 0 : index
      %53 = vector.load %arg5[%c0_24, %c0_25] : memref<1x128xf32, #tpu.memory_space<vmem>>, vector<1x128xf32>
      tpu.vector_store %arg5[%c0_24, %c0_25], %52 {strides = array<i32>} : memref<1x128xf32, #tpu.memory_space<vmem>>, vector<1x128xf32>,
    } else {
    }
    %5 = tpu.iota {dimensions = array<i32: 0>} : vector<128x128xi32>
    %6 = tpu.iota {dimensions = array<i32: 1>} : vector<128x128xi32>
    %7 = arith.cmpi eq, %5, %6 : vector<128x128xi32>
    %8 = tpu.iota {dimensions = array<i32: 1>} : vector<1x128xi32>
    %cst = arith.constant 0.000000e+00 : f32
    %9 = vector.broadcast %cst : f32 to vector<1x128xf32>
    %c0 = arith.constant 0 : index
    %c0_1 = arith.constant 0 : index
    %10 = vector.load %arg2[%c0, %c0_1] : memref<128x128xf32, #tpu.memory_space<vmem>>, vector<128x128xf32>
    %cst_2 = arith.constant 0.000000e+00 : f32
    %11 = vector.broadcast %cst_2 : f32 to vector<128x128xf32>
    %12 = arith.select %7, %10, %11 : vector<128x128xi1>, vector<128x128xf32>
    %cst_3 = arith.constant dense<0.000000e+00> : vector<128xf32>
    %13 = vector.multi_reduction <add>, %12, %cst_3 [0] : vector<128x128xf32> to vector<128xf32>
    %14 = vector.shape_cast %13 : vector<128xf32> to vector<1x128xf32>
    %c2_i32 = arith.constant 2 : i32
    %15 = arith.muli %1, %c2_i32 : i32
    %c0_i32_4 = arith.constant 0 : i32
    %16 = arith.addi %15, %c0_i32_4 : i32
    %c128_i32 = arith.constant 128 : i32
    %17 = arith.muli %16, %c128_i32 : i32
    %18 = vector.broadcast %17 : i32 to vector<1x128xi32>
    %19 = arith.addi %18, %8 : vector<1x128xi32>
    %c300_i32 = arith.constant 300 : i32
    %20 = vector.broadcast %c300_i32 : i32 to vector<1x128xi32>
    %21 = arith.cmpi slt, %19, %20 : vector<1x128xi32>
    %cst_5 = arith.constant 1.000000e+00 : f32
    %22 = vector.broadcast %cst_5 : f32 to vector<1x128xf32>
    %23 = arith.select %21, %14, %22 : vector<1x128xi1>, vector<1x128xf32>
    %cst_6 = arith.constant 1.000000e-24 : f32
    %24 = vector.broadcast %cst_6 : f32 to vector<1x128xf32>
    %25 = arith.addf %23, %24 : vector<1x128xf32>
    %26 = math.log %25 : vector<1x128xf32>
    %27 = arith.subf %9, %26 : vector<1x128xf32>
    %c0_7 = arith.constant 0 : index
    %c0_8 = arith.constant 0 : index
    %28 = vector.load %arg3[%c0_7, %c0_8] : memref<128x128xf32, #tpu.memory_space<vmem>>, vector<128x128xf32>
    %cst_9 = arith.constant 0.000000e+00 : f32
    %29 = vector.broadcast %cst_9 : f32 to vector<128x128xf32>
    %30 = arith.select %7, %28, %29 : vector<128x128xi1>, vector<128x128xf32>
    %cst_10 = arith.constant dense<0.000000e+00> : vector<128xf32>
    %31 = vector.multi_reduction <add>, %30, %cst_10 [0] : vector<128x128xf32> to vector<128xf32>
    %32 = vector.shape_cast %31 : vector<128xf32> to vector<1x128xf32>
    %c2_i32_11 = arith.constant 2 : i32
    %33 = arith.muli %1, %c2_i32_11 : i32
    %c1_i32_12 = arith.constant 1 : i32
    %34 = arith.addi %33, %c1_i32_12 : i32
    %c128_i32_13 = arith.constant 128 : i32
    %35 = arith.muli %34, %c128_i32_13 : i32
    %36 = vector.broadcast %35 : i32 to vector<1x128xi32>
    %37 = arith.addi %36, %8 : vector<1x128xi32>
    %c300_i32_14 = arith.constant 300 : i32
    %38 = vector.broadcast %c300_i32_14 : i32 to vector<1x128xi32>
    %39 = arith.cmpi slt, %37, %38 : vector<1x128xi32>
    %cst_15 = arith.constant 1.000000e+00 : f32
    %40 = vector.broadcast %cst_15 : f32 to vector<1x128xf32>
    %41 = arith.select %39, %32, %40 : vector<1x128xi1>, vector<1x128xf32>
    %cst_16 = arith.constant 1.000000e-24 : f32
    %42 = vector.broadcast %cst_16 : f32 to vector<1x128xf32>
    %43 = arith.addf %41, %42 : vector<1x128xf32>
    %44 = math.log %43 : vector<1x128xf32>
    %45 = arith.subf %27, %44 : vector<1x128xf32>
    %c0_17 = arith.constant 0 : index
    %c0_18 = arith.constant 0 : index
    %46 = vector.load %arg5[%c0_17, %c0_18] : memref<1x128xf32, #tpu.memory_space<vmem>>, vector<1x128xf32>
    %47 = arith.addf %46, %45 : vector<1x128xf32>
    %c0_19 = arith.constant 0 : index
    %c0_20 = arith.constant 0 : index
    %48 = vector.load %arg5[%c0_19, %c0_20] : memref<1x128xf32, #tpu.memory_space<vmem>>, vector<1x128xf32>
    tpu.vector_store %arg5[%c0_19, %c0_20], %47 {strides = array<i32>} : memref<1x128xf32, #tpu.memory_space<vmem>>, vector<1x128xf32>,
    %c0_i32_21 = arith.constant 0 : i32
    %49 = arith.cmpi eq, %arg1, %c0_i32_21 : i32
    %50 = arith.extui %49 : i1 to i32
    %c0_i32_22 = arith.constant 0 : i32
    %51 = arith.cmpi ne, %50, %c0_i32_22 : i32
    scf.if %51 {
      %c0_23 = arith.constant 0 : index
      %c0_24 = arith.constant 0 : index
      %52 = vector.load %arg5[%c0_23, %c0_24] : memref<1x128xf32, #tpu.memory_space<vmem>>, vector<1x128xf32>
      %53 = vector.shape_cast %52 : vector<1x128xf32> to vector<1x1x128xf32>
      %c0_25 = arith.constant 0 : index
      %c0_26 = arith.constant 0 : index
      %c0_27 = arith.constant 0 : index
      %54 = vector.load %arg4[%c0_25, %c0_26, %c0_27] : memref<1x1x128xf32, #tpu.memory_space<vmem>>, vector<1x1x128xf32>
      tpu.vector_store %arg4[%c0_25, %c0_26, %c0_27], %53 {strides = array<i32>} : memref<1x1x128xf32, #tpu.memory_space<vmem>>, vector<1x1x128xf32>,
    } else {
    }
    return
  }
  func.func @transform_0(%arg0: i32, %arg1: i32) -> (i32, i32) {
    %c1_i32 = arith.constant 1 : i32
    %0 = arith.muli %arg0, %c1_i32 : i32
    %1 = arith.addi %0, %arg1 : i32
    %c2_i32 = arith.constant 2 : i32
    %2 = arith.muli %1, %c2_i32 : i32
    %c0_i32 = arith.constant 0 : i32
    %3 = arith.addi %2, %c0_i32 : i32
    %c2_i32_0 = arith.constant 2 : i32
    %4 = arith.minsi %3, %c2_i32_0 : i32
    %c0_i32_1 = arith.constant 0 : i32
    return %4, %4 : i32, i32
  }
  func.func @transform_1(%arg0: i32, %arg1: i32) -> (i32, i32) {
    %c1_i32 = arith.constant 1 : i32
    %0 = arith.muli %arg0, %c1_i32 : i32
    %1 = arith.addi %0, %arg1 : i32
    %c2_i32 = arith.constant 2 : i32
    %2 = arith.muli %1, %c2_i32 : i32
    %c1_i32_0 = arith.constant 1 : i32
    %3 = arith.addi %2, %c1_i32_0 : i32
    %c2_i32_1 = arith.constant 2 : i32
    %4 = arith.minsi %3, %c2_i32_1 : i32
    %c0_i32 = arith.constant 0 : i32
    return %4, %4 : i32, i32
  }
  func.func @transform_2(%arg0: i32, %arg1: i32) -> (i32, i32, i32) {
    %c0_i32 = arith.constant 0 : i32
    %c0_i32_0 = arith.constant 0 : i32
    %c0_i32_1 = arith.constant 0 : i32
    return %arg0, %c0_i32, %c0_i32_0 : i32, i32, i32
  }
}

</mosaic_0001>

<bundles_post_ra>
// kernel: tpu_custom_call.1
= control target key start
LH: loop header
LB: loop body
LE: loop exit
PB: predicated region body
PF: predicated region fallthrough
CT: control target
= control target key end

     0   :  { %7 = vsyncpa [#allocation4], 0  ;;  %s1340_s0 = inlined_call_operand.hbm [shape: f32[300,300], index: 0, kind: input, shape index: {}]   ;;  %s1341_s1 = inlined_call_operand.hbm [shape: f32[300,300], index: 1, kind: input, shape index: {}]   ;;  %s1342_s2 = inlined_call_operand.hbm [shape: f32[2,1,128], index: 2, kind: output, shape index: {}]  }
   0x1   :  { %9 = vsyncpa [#allocation4 + $0x1], 0 }
   0x2   :  { %10 = vsyncpa [#allocation7], 0 }
   0x3   :  { %12 = vsyncpa [#allocation7 + $0x1], 0 }
   0x4   :  { %13 = vsyncpa [#allocation5], 0 }
   0x5   :  { %15 = vsyncpa [#allocation5 + $0x1], 0  ;;  %s935_s9 = smov 0   ;;  %s937_s10 = smov 0  }
   0x6   :  { %s939_s11 = smov 0   ;;  %s941_s12 = smov 0  }
   0x7   :  { %s943_s13 = smov 0   ;;  %s945_s14 = smov 0  }
   0x8   :  { %s947_s15 = smov 0   ;;  %s949_s16 = smov 0  }
   0x9   :  { %s951_s17 = smov 0   ;;  %s953_s18 = smov 0  }
   0xa   :  { %s955_s19 = smov 0   ;;  %s957_s20 = smov 0  }
   0xb LB: > { %1348 = sst [smem:[#allocation12_spill]] %s872_s11  ;;  %s568_s21 = sadd.s32 4294967295, %s908_s20   ;;  %s908_s20 = sphi %s957_s20, %s21_s20   ;;  %s904_s19 = sphi %s955_s19, %s1378_s19   ;;  %s900_s18 = sphi %s953_s18, %s1369_s18   ;;  %s896_s17 = sphi %s951_s17, %s1368_s17   ;;  %s892_s16 = sphi %s949_s16, %s1377_s16   ;;  %s888_s15 = sphi %s947_s15, %s1376_s15   ;;  %s884_s14 = sphi %s945_s14, %s1375_s14   ;;  %s880_s13 = sphi %s943_s13, %s1374_s13   ;;  %s876_s12 = sphi %s941_s12, %s1373_s12   ;;  %s872_s11 = sphi %s939_s11, %s1365_s11   ;;  %s868_s10 = sphi %s937_s10, %s1372_s10   ;;  %s864_s9 = sphi %s935_s9, %s1371_s9  }
   0xc   : > { %1349 = sst [smem:[#allocation13_spill]] %s896_s17  ;;  %s33_s23 = sadd.s32 1, %s904_s19 }
   0xd   : > { %1350 = sst [smem:[#allocation14_spill]] %s904_s19  ;;  %s570_s24 = sshll.u32 %s904_s19, 1 }
   0xe   : > { %p35_p0 = scmp.ge.s32.totalorder %s33_s23, 2  ;;  %p39_p1 = scmp.lt.s32.totalorder %s570_s24, 2 }
   0xf   : > { %s50_s25 = sadd.s32 1, %s896_s17  ;;  %p57_p2 = scmp.ne.s32.totalorder %s896_s17, %s892_s16 }
  0x10   : > { %s1380_s23 = smov (%p35_p0, %s33_s23), 0  ;;  %p58_p3 = scmp.eq.s32.totalorder %s908_s20, 0 }
  0x11   : > { %1351 = sst [smem:[#allocation15_spill]] %s1380_s23  ;;  %s571_s27 = sshll.u32 %s1380_s23, 1 }
  0x12   : > { %s1002_s26 = scalar_select %p39_p1, %s570_s24, 2 }
  0x13   : > { %p43_p4 = scmp.lt.s32.totalorder %s571_s27, 2  ;;  %p63_p5 = scmp.ne.s32.totalorder %s892_s16, %s888_s15 }
  0x14   : > { %p1009_p6 = por %p58_p3, %p57_p2  ;;  %p1015_p7 = scmp.eq.s32.totalorder %s568_s21, 0 }
  0x15   : > { %s44_s30 = scalar_select %p43_p4, %s571_s27, 2 }
  0x16   : > { %p1021_p8 = por %p1015_p7, %p63_p5  ;;  %s75_s4 = sadd.s32 1, %s570_s24 }
  0x17   : > { %s45_s5 = ssub.s32 %s1002_s26, %s44_s30  ;;  %p76_p9 = scmp.lt.s32.totalorder %s75_s4, 2 }
  0x18   : > { %s47_s6 = sor.u32 %s45_s5, %s45_s5  ;;  %s80_s7 = sadd.s32 1, %s571_s27 }
  0x19   : > { %p48_p10 = scmp.eq.s32.totalorder %s47_s6, 0  ;;  %p81_p11 = scmp.lt.s32.totalorder %s80_s7, 2 }
  0x1a   : > { %s1382_s4 = smov (!%p76_p9, %s75_s4), 2  ;;  %s88_s15 = sadd.s32 1, %s884_s14 }
  0x1b   : > { %s1029_s8 = scalar_select %p48_p10, %s896_s17, %s50_s25  }
  0x1c   : > { %s1384_s7 = smov (!%p81_p11, %s80_s7), 2  ;;  %p95_p12 = scmp.ne.s32.totalorder %s884_s14, %s880_s13 }
  0x1d   : > { %1355 = sst [smem:[#allocation16_spill]] %s1029_s8  ;;  %s83_s24 = ssub.s32 %s1382_s4, %s1384_s7 }
  0x1e   : > { %p101_p13 = scmp.ne.s32.totalorder %s880_s13, %s876_s12  ;;  %s85_s27 = sor.u32 %s83_s24, %s83_s24 }
  0x1f   : > { %p1039_p0 = por %p95_p12, %p58_p3  ;;  %p86_p1 = scmp.eq.s32.totalorder %s85_s27, 0 }
  0x20   : > { %p1045_p2 = por %p101_p13, %p1015_p7  ;;  %s111_s5 = ssub.s32 %s904_s19, %s1380_s23 }
  0x21   : > { %s114_s6 = sadd.s32 1, %s872_s11  ;;  %p112_p4 = scmp.eq.s32.totalorder %s111_s5, 0 }
  0x22   : > { %s1053_s22 = scalar_select %p86_p1, %s884_s14, %s88_s15  }
  0x23   : > { %p124_p5 = scmp.ne.s32.totalorder %s872_s11, %s868_s10  ;;  %p125_p9 = scmp.eq.s32.totalorder %s568_s21, 1 }
  0x24   : > { %1358 = sst [smem:[#allocation17_spill]] %s1053_s22  ;;  %p130_p10 = scmp.ne.s32.totalorder %s868_s10, %s864_s9 }
  0x25   : > { %s1062_s12 = scalar_select %p112_p4, %s872_s11, %s114_s6  }
  0x26   : > { %p1064_p3 = por %p125_p9, %p124_p5  ;;  %s1361_s29 = sadd.s32 4294967294, %s908_s20  }
  0x27   : > { %1359 = sst [smem:[#allocation18_spill]] %s1062_s12  ;;  %p131_p7 = scmp.eq.s32.totalorder %s1361_s29, 1 }
  0x28   : > { %p1347_p12 = scmp.ge.s32.totalorder %s908_s20, 2 }
  0x29   : > { %p1070_p11 = por %p131_p7, %p130_p10 }
  0x2a   : > { %147 = sbr.rel (%p1347_p12) target bundleno = 95 (0x5f), region = 16 }
  0x2f   : > { %150 = sbr.rel (!%p1009_p6) target bundleno = 71 (0x47), region = 20  ;;  %s151_s21 = sand.u32 (%p1009_p6), 1, %s896_s17  }
  0x30   : > { %s578_s15 = sshll.u32 (%p1009_p6), %s1002_s26, 4  ;;  %s576_s27 = sshll.u32 (%p1009_p6), %s151_s21, 7 }
  0x31   : > { %s161_s5 = ssub.s32 (%p1009_p6), 38, %s578_s15  ;;  %s1084_s23 = scalar_lea.sflag (%p1009_p6), [#allocation4], %s151_s21 }
  0x32   : > { %p162_p13 = scmp.lt.s32.totalorder (%p1009_p6), %s161_s5, 16  ;;  %s155_s19 = scalar_lea.vmem (%p1009_p6), [#allocation3], %s576_s27 }
  0x34   : > { %s1386_s5 = smov (!%p162_p13, %s161_s5), 16 }
  0x35   : > { %s1081_s6 = sshll.u32 %s1386_s5, 7 }
  0x36   : > { %s166_s29 = ssub.s32 2048, %s1081_s6 }
  0x37   : > { %167 = vsyncadd %s1084_s23, %s166_s29  ;;  %p580_p6 = scmp.ne.s32.totalorder %s1081_s6, 0  ;;  %s606_s28 = smul.u32 48, %s1002_s26 }
  0x38   : > { %s174_s8 = sshll.u32 %s155_s19, 4  ;;  %s910_s27 = smov [#allocation3]   ;;  %s175_s8 = int_to_ptr.vmem [resolvable:$true] %s174_s8 }
  0x39   : > { %s170_s15 = sadd.s32 %s606_s28, %s1002_s26  ;;  %s736_s21 = scalar_lea.vmem %s175_s8, %s1081_s6 }
  0x3a   : > { %s582_s17 = sshll.u32 %s170_s15, 7  ;;  %p737_p1 = scmp.ne.s32.totalorder %s175_s8, %s736_s21 }
  0x3b   : > { %s172_s12 = scalar_lea.hbm %s1340_s0, %s582_s17  ;;  %s740_s29 = sshll.u32 %s910_s27, 4  ;;  %s741_s29 = int_to_ptr.vmem [resolvable:$false] %s740_s29 }
  0x3c   : > { %p738_p4 = pnand %p737_p1, %p580_p6  ;;  %s742_s11 = scalar_lea.vmem %s741_s29, 4096 }
  0x3d   : > { %p743_p9 = scmp.lt.s32.totalorder %s175_s8, %s741_s29  ;;  %p744_p10 = scmp.lt.s32.totalorder %s742_s11, %s736_s21 }
  0x3e   : > { %p739_p5 = pneg %p738_p4 }
  0x3f   : > { %p745_p7 = por %p744_p10, %p743_p9 }
  0x41   : > { %p746_p13 = pnand %p745_p7, %p739_p5 }
  0x43   : > { %749 = shalt.err (!%p746_p13)
}
  0x44   : > { %s911_s19 = smov 384   ;;  %s912_s22 = smov 128  }
  0x45   : > { %s913_s17 = smov 8  }
  0x46   : > { %180 = dma.hbm_to_vmem [thread:$0]  (%p580_p6), %s172_s12, %s1081_s6, %s175_s8, %s1084_s23, %s911_s19, %s912_s22, %s913_s17  }
  0x47 PF: > { %183 = sbr.rel (!%p1039_p0) target bundleno = 95 (0x5f), region = 24  ;;  %s184_s26 = sand.u32 (%p1039_p0), 1, %s884_s14  }
  0x48   : > { %s587_s28 = sshll.u32 (%p1039_p0), %s1382_s4, 4  ;;  %s585_s11 = sshll.u32 (%p1039_p0), %s184_s26, 7 }
  0x49   : > { %s195_s15 = ssub.s32 (%p1039_p0), 38, %s587_s28  ;;  %s1107_s27 = scalar_lea.sflag (%p1039_p0), [#allocation7], %s184_s26 }
  0x4a   : > { %p196_p1 = scmp.lt.s32.totalorder (%p1039_p0), %s195_s15, 16  ;;  %s188_s23 = scalar_lea.vmem (%p1039_p0), [#allocation6], %s585_s11 }
  0x4c   : > { %s1388_s15 = smov (!%p196_p1, %s195_s15), 16 }
  0x4d   : > { %s1104_s5 = sshll.u32 %s1388_s15, 7 }
  0x4e   : > { %s200_s21 = ssub.s32 2048, %s1104_s5 }
  0x4f   : > { %201 = vsyncadd %s1107_s27, %s200_s21  ;;  %p589_p0 = scmp.ne.s32.totalorder %s1104_s5, 0  ;;  %s607_s8 = smul.u32 48, %s1382_s4 }
  0x50   : > { %s208_s30 = sshll.u32 %s188_s23, 4  ;;  %s914_s26 = smov [#allocation6]   ;;  %s209_s30 = int_to_ptr.vmem [resolvable:$true] %s208_s30 }
  0x51   : > { %s204_s12 = sadd.s32 %s607_s8, %s1382_s4  ;;  %s762_s17 = scalar_lea.vmem %s209_s30, %s1104_s5 }
  0x52   : > { %s591_s6 = sshll.u32 %s204_s12, 7  ;;  %p763_p6 = scmp.ne.s32.totalorder %s209_s30, %s762_s17 }
  0x53   : > { %s206_s22 = scalar_lea.hbm %s1341_s1, %s591_s6  ;;  %s766_s28 = sshll.u32 %s914_s26, 4  ;;  %s767_s28 = int_to_ptr.vmem [resolvable:$false] %s766_s28 }
  0x54   : > { %p764_p4 = pnand %p763_p6, %p589_p0  ;;  %s768_s11 = scalar_lea.vmem %s767_s28, 4096 }
  0x55   : > { %p769_p9 = scmp.lt.s32.totalorder %s209_s30, %s767_s28  ;;  %p770_p10 = scmp.lt.s32.totalorder %s768_s11, %s762_s17 }
  0x56   : > { %p765_p5 = pneg %p764_p4 }
  0x57   : > { %p771_p7 = por %p770_p10, %p769_p9 }
  0x59   : > { %p772_p13 = pnand %p771_p7, %p765_p5 }
  0x5b   : > { %775 = shalt.err (!%p772_p13)
}
  0x5c   : > { %s915_s4 = smov 384   ;;  %s916_s15 = smov 128  }
  0x5d   : > { %s917_s21 = smov 8  }
  0x5e   : > { %214 = dma.hbm_to_vmem [thread:$0]  (%p589_p0), %s206_s22, %s1104_s5, %s209_s30, %s1107_s27, %s915_s4, %s916_s15, %s917_s21  }
  0x5f PF: > { %p594_p1 = scmp.ge.s32.totalorder %s908_s20, 1  ;;  %p216_p6 = scmp.lt.s32.totalorder %s908_s20, 3 }
  0x61   : > { %p217_p4 = pnand %p594_p1, %p216_p6 }
  0x62   : > { %s222_s23 = sand.u32 (!%p217_p4), 1, %s892_s16  }
  0x63   : > { %220 = sbr.rel (%p217_p4) target bundleno = 206 (0xce), region = 28  ;;  %s595_s8 = sshll.u32 (!%p217_p4), %s222_s23, 7 }
  0x64   : > { %s223_s12 = scalar_lea.sflag (!%p217_p4), [#allocation4], %s222_s23  ;;  %s1126_s6 = scalar_lea.vmem (!%p217_p4), [#allocation3], %s595_s8 }
  0x68   : > { %851 = dma.done.wait (%p1021_p8), %s223_s12, 2048  }
  0x69   : > { %853 = vsyncadd (%p1021_p8), %s223_s12, 4294965248  ;;  %s231_s5 = sand.u32 1, %s880_s13  }
  0x6a   : > { %s596_s27 = sshll.u32 %s231_s5, 7  ;;  %s232_s30 = scalar_lea.sflag [#allocation7], %s231_s5 }
  0x6b   : > { %s1133_s29 = scalar_lea.vmem [#allocation6], %s596_s27 }
  0x6c   : > { %855 = dma.done.wait (%p1045_p2), %s232_s30, 2048  }
  0x6d   : > { %857 = vsyncadd (%p1045_p2), %s232_s30, 4294965248  ;;  %v285_v0 = vlaneseq  ;;  %v918_v1 = vmov 0.0   ;;  %v320_v7 = vld [vmem:[%s1126_s6] sm:$0xff]  ;;  %v321_v8 = vld [vmem:[%s1126_s6 + $0x8] sm:$0xff]  ;;  %s597_s3 = sshll.u32 %s900_s18, 8  ;;  %s258_s19 = sand.u32 1, %s868_s10  }
  0x6e   : > { %284 = vst [vmem:[#allocation2] sm:$0x1] %v918_v1  ;;  %v322_v10 = vld [vmem:[%s1126_s6 + $0x10] sm:$0xff]  ;;  %v323_v14 = vld [vmem:[%s1126_s6 + $0x18] sm:$0xff]  ;;  %v324_v17 = vld [vmem:[%s1126_s6 + $0x20] sm:$0xff]  ;;  %s604_s25 = sadd.s32 128, %s597_s3 }
  0x6f   : > { %v1139_v2 = vshrl.u32 %v285_v0, 7  ;;  %v1142_v4 = vand.u32 127, %v285_v0  ;;  %v382_v19 = vld [vmem:[%s1133_s29] sm:$0xff]  ;;  %v383_v20 = vld [vmem:[%s1133_s29 + $0x8] sm:$0xff]  ;;  %v384_v25 = vld [vmem:[%s1133_s29 + $0x10] sm:$0xff]  ;;  %s259_s22 = scalar_lea.vmem [#allocation8], %s258_s19 }
  0x70   : > { %v325_v23 = vld [vmem:[%s1126_s6 + $0x28] sm:$0xff]  ;;  %v326_v30 = vld [vmem:[%s1126_s6 + $0x30] sm:$0xff]  ;;  %v385_v32 = vld [vmem:[%s1133_s29 + $0x18] sm:$0xff]  ;;  %s467_s17 = sshll.u32 %s259_s22, 4  ;;  %s600_s26 = sshll.u32 %s900_s18, 4  ;;  %s1278_s17 = int_to_ptr.vmem [resolvable:$true] %s467_s17 }
  0x71   : > { %v287_v3 = vadd.s32 8, %v1139_v2  ;;  %v288_v5 = vadd.s32 16, %v1139_v2  ;;  %v289_v6 = vadd.s32 24, %v1139_v2  ;;  %vm304_vm0 = vcmp.eq.s32.totalorder %v1139_v2, %v1142_v4  ;;  %v327_v36 = vld [vmem:[%s1126_s6 + $0x38] sm:$0xff]  ;;  %v386_v38 = vld [vmem:[%s1133_s29 + $0x20] sm:$0xff]  ;;  %v387_v45 = vld [vmem:[%s1133_s29 + $0x28] sm:$0xff]  ;;  %s465_s4 = scalar_lea.hbm %s1342_s2, %s600_s26 }
  0x72   : > { %v290_v9 = vadd.s32 32, %v1139_v2  ;;  %v336_v11 = vsel %vm304_vm0, %v320_v7, 0.0  ;;  %v291_v13 = vadd.s32 40, %v1139_v2  ;;  %v292_v16 = vadd.s32 48, %v1139_v2  ;;  %v328_v43 = vld [vmem:[%s1126_s6 + $0x40] sm:$0xff]  ;;  %v329_v50 = vld [vmem:[%s1126_s6 + $0x48] sm:$0xff] }
  0x73   : > { %vm305_vm1 = vcmp.eq.s32.totalorder %v287_v3, %v1142_v4  ;;  %vm306_vm2 = vcmp.eq.s32.totalorder %v288_v5, %v1142_v4  ;;  %vm307_vm3 = vcmp.eq.s32.totalorder %v289_v6, %v1142_v4  ;;  %v293_v22 = vadd.s32 56, %v1139_v2  ;;  %v388_v52 = vld [vmem:[%s1133_s29 + $0x30] sm:$0xff]  ;;  %v389_v59 = vld [vmem:[%s1133_s29 + $0x38] sm:$0xff]  ;;  %v390_v3 = vld [vmem:[%s1133_s29 + $0x40] sm:$0xff]  ;;  %s455_s15 = scalar_lea.sflag [#allocation5], %s258_s19  ;;  %s776_s21 = scalar_lea.vmem %s1278_s17, 16 }
  0x74   : > { %v337_v12 = vsel %vm305_vm1, %v321_v8, 0.0  ;;  %v338_v15 = vsel %vm306_vm2, %v322_v10, 0.0  ;;  %vm308_vm4 = vcmp.eq.s32.totalorder %v290_v9, %v1142_v4  ;;  %v339_v21 = vsel %vm307_vm3, %v323_v14, 0.0  ;;  %v330_v57 = vld [vmem:[%s1126_s6 + $0x50] sm:$0xff]  ;;  %v331_v0 = vld [vmem:[%s1126_s6 + $0x58] sm:$0xff]  ;;  %v332_v9 = vld [vmem:[%s1126_s6 + $0x60] sm:$0xff]  ;;  %p777_p8 = scmp.ne.s32.totalorder %s1278_s17, %s776_s21 }
  0x75   : > { %v352_v18 = vadd.f32 %v337_v12, %v336_v11  ;;  %vm309_vm5 = vcmp.eq.s32.totalorder %v291_v13, %v1142_v4  ;;  %v340_v26 = vsel %vm308_vm4, %v324_v17, 0.0  ;;  %v398_v27 = vsel %vm304_vm0, %v382_v19, 0.0  ;;  %v391_v11 = vld [vmem:[%s1133_s29 + $0x48] sm:$0xff]  ;;  %s919_s23 = smov [#allocation8]  }
  0x76   : > { %v399_v28 = vsel %vm305_vm1, %v383_v20, 0.0  ;;  %v294_v29 = vadd.s32 64, %v1139_v2  ;;  %vm310_vm6 = vcmp.eq.s32.totalorder %v292_v16, %v1142_v4  ;;  %v341_v33 = vsel %vm309_vm5, %v325_v23, 0.0  ;;  %v333_v16 = vld [vmem:[%s1126_s6 + $0x68] sm:$0xff]  ;;  %p778_p2 = pnand %p777_p8, %p1064_p3  ;;  %s780_s8 = sshll.u32 %s919_s23, 4  ;;  %s781_s8 = int_to_ptr.vmem [resolvable:$false] %s780_s8 }
  0x77   : > { %v353_v24 = vadd.f32 %v352_v18, %v338_v15  ;;  %v400_v34 = vsel %vm306_vm2, %v384_v25, 0.0  ;;  %v295_v35 = vadd.s32 72, %v1139_v2  ;;  %vm311_vm7 = vcmp.eq.s32.totalorder %v293_v22, %v1142_v4  ;;  %v392_v18 = vld [vmem:[%s1133_s29 + $0x50] sm:$0xff]  ;;  %s782_s18 = scalar_lea.vmem %s781_s8, 32  ;;  %p783_p5 = scmp.lt.s32.totalorder %s1278_s17, %s781_s8 }
  0x78   : > { %v414_v39 = vadd.f32 %v399_v28, %v398_v27  ;;  %v342_v40 = vsel %vm310_vm6, %v326_v30, 0.0  ;;  %v401_v41 = vsel %vm307_vm3, %v385_v32, 0.0  ;;  %v296_v42 = vadd.s32 80, %v1139_v2  ;;  %v334_v22 = vld [vmem:[%s1126_s6 + $0x70] sm:$0xff]  ;;  %v335_v27 = vld [vmem:[%s1126_s6 + $0x78] sm:$0xff]  ;;  %p779_p0 = pneg %p778_p2  ;;  %p784_p9 = scmp.lt.s32.totalorder %s782_s18, %s776_s21 }
  0x79   : > { %v354_v31 = vadd.f32 %v353_v24, %v339_v21  ;;  %vm312_vm8 = vcmp.eq.s32.totalorder %v294_v29, %v1142_v4  ;;  %v343_v47 = vsel %vm311_vm7, %v327_v36, 0.0  ;;  %v402_v48 = vsel %vm308_vm4, %v386_v38, 0.0  ;;  %v394_v29 = vld [vmem:[%s1133_s29 + $0x60] sm:$0xff] }
  0x7a   : > { %v415_v46 = vadd.f32 %v414_v39, %v400_v34  ;;  %v297_v49 = vadd.s32 88, %v1139_v2  ;;  %vm313_vm9 = vcmp.eq.s32.totalorder %v295_v35, %v1142_v4  ;;  %v344_v54 = vsel %vm312_vm8, %v328_v43, 0.0  ;;  %v395_v34 = vld [vmem:[%s1133_s29 + $0x68] sm:$0xff]  ;;  %v396_v39 = vld [vmem:[%s1133_s29 + $0x70] sm:$0xff]  ;;  %v397_v43 = vld [vmem:[%s1133_s29 + $0x78] sm:$0xff]  ;;  %p785_p10 = por %p784_p9, %p783_p5 }
  0x7b   : > { %v355_v37 = vadd.f32 %v354_v31, %v340_v26  ;;  %v403_v55 = vsel %vm309_vm5, %v387_v45, 0.0  ;;  %v298_v56 = vadd.s32 96, %v1139_v2  ;;  %vm314_vm10 = vcmp.eq.s32.totalorder %v296_v42, %v1142_v4 }
  0x7c   : > { %v416_v53 = vadd.f32 %v415_v46, %v401_v41  ;;  %v345_v61 = vsel %vm313_vm9, %v329_v50, 0.0  ;;  %v404_v62 = vsel %vm310_vm6, %v388_v52, 0.0  ;;  %v299_v63 = vadd.s32 104, %v1139_v2  ;;  %p786_p7 = pnand %p785_p10, %p779_p0 }
  0x7d   : > { %v356_v44 = vadd.f32 %v355_v37, %v341_v33  ;;  %vm315_vm11 = vcmp.eq.s32.totalorder %v297_v49, %v1142_v4  ;;  %v346_v6 = vsel %vm314_vm10, %v330_v57, 0.0  ;;  %v405_v7 = vsel %vm311_vm7, %v389_v59, 0.0 }
  0x7e   : > { %v417_v60 = vadd.f32 %v416_v53, %v402_v48  ;;  %v300_v8 = vadd.s32 112, %v1139_v2  ;;  %vm316_vm12 = vcmp.eq.s32.totalorder %v298_v56, %v1142_v4  ;;  %v347_v13 = vsel %vm315_vm11, %v331_v0, 0.0 }
  0x7f   : > { %v357_v51 = vadd.f32 %v356_v44, %v342_v40  ;;  %v406_v14 = vsel %vm312_vm8, %v390_v3, 0.0  ;;  %v301_v15 = vadd.s32 120, %v1139_v2  ;;  %vm317_vm13 = vcmp.eq.s32.totalorder %v299_v63, %v1142_v4  ;;  %v393_v2 = vld [vmem:[%s1133_s29 + $0x58] sm:$0xff] }
  0x80   : > { %v418_v5 = vadd.f32 %v417_v60, %v403_v55  ;;  %v348_v20 = vsel %vm316_vm12, %v332_v9, 0.0  ;;  %v407_v21 = vsel %vm313_vm9, %v391_v11, 0.0  ;;  %vm318_vm14 = vcmp.eq.s32.totalorder %v300_v8, %v1142_v4 }
  0x81   : > { %v358_v58 = vadd.f32 %v357_v51, %v343_v47  ;;  %v349_v25 = vsel %vm317_vm13, %v333_v16, 0.0  ;;  %v408_v26 = vsel %vm314_vm10, %v392_v18, 0.0  ;;  %vm319_vm15 = vcmp.eq.s32.totalorder %v301_v15, %v1142_v4 }
  0x82   : > { %v419_v12 = vadd.f32 %v418_v5, %v404_v62  ;;  %v350_v31 = vsel %vm318_vm14, %v334_v22, 0.0  ;;  %v409_v32 = vsel %vm315_vm11, %v393_v2, 0.0  ;;  %v351_v36 = vsel %vm319_vm15, %v335_v27, 0.0 }
  0x83   : > { %v359_v1 = vadd.f32 %v358_v58, %v344_v54  ;;  %v410_v37 = vsel %vm316_vm12, %v394_v29, 0.0  ;;  %v411_v41 = vsel %vm317_vm13, %v395_v34, 0.0  ;;  %v412_v45 = vsel %vm318_vm14, %v396_v39, 0.0 }
  0x84   : > { %v420_v19 = vadd.f32 %v419_v12, %v405_v7  ;;  %v413_v48 = vsel %vm319_vm15, %v397_v43, 0.0  ;;  %v374_v50 = vstv %s597_s3  ;;  %v438_v59 = vstv %s604_s25 }
  0x85   : > { %v360_v10 = vadd.f32 %v359_v1, %v345_v61  ;;  %v375_v54 = vadd.s32 %v374_v50, %v1142_v4  ;;  %v439_v62 = vadd.s32 %v438_v59, %v1142_v4 }
  0x86   : > { %v421_v24 = vadd.f32 %v420_v19, %v406_v14 }
  0x87   : > { %v361_v17 = vadd.f32 %v360_v10, %v346_v6  ;;  %vm376_vm0 = vcmp.lt.s32.totalorder %v375_v54, 300  ;;  %vm440_vm1 = vcmp.lt.s32.totalorder %v439_v62, 300 }
  0x88   : > { %v422_v30 = vadd.f32 %v421_v24, %v407_v21 }
  0x89   : > { %v362_v23 = vadd.f32 %v361_v17, %v347_v13  ;;  %v446_v13 = vld [vmem:[#allocation2] sm:$0x1] }
  0x8a   : > { %v423_v35 = vadd.f32 %v422_v30, %v408_v26 }
  0x8b   : > { %v363_v28 = vadd.f32 %v362_v23, %v348_v20 }
  0x8c   : > { %v424_v40 = vadd.f32 %v423_v35, %v409_v32 }
  0x8d   : > { %v364_v33 = vadd.f32 %v363_v28, %v349_v25 }
  0x8e   : > { %v425_v44 = vadd.f32 %v424_v40, %v410_v37 }
  0x8f   : > { %v365_v38 = vadd.f32 %v364_v33, %v350_v31 }
  0x90   : > { %v426_v47 = vadd.f32 %v425_v44, %v411_v41 }
  0x91   : > { %v366_v42 = vadd.f32 %v365_v38, %v351_v36 }
  0x92   : > { %v427_v51 = vadd.f32 %v426_v47, %v412_v45 }
  0x93   : > { %v367_v46 = vrot.slane %v366_v42, 4 }
  0x94   : > { %v428_v53 = vadd.f32 %v427_v51, %v413_v48 }
  0x95   : > { %v368_v49 = vadd.f32 %v367_v46, %v366_v42 }
  0x96   : > { %v429_v56 = vrot.slane %v428_v53, 4 }
  0x97   : > { %v369_v52 = vrot.slane %v368_v49, 2 }
  0x98   : > { %v430_v58 = vadd.f32 %v429_v56, %v428_v53 }
  0x99   : > { %v370_v55 = vadd.f32 %v369_v52, %v368_v49 }
  0x9a   : > { %v431_v61 = vrot.slane %v430_v58, 2 }
  0x9b   : > { %v371_v57 = vrot.slane %v370_v55, 1 }
  0x9c   : > { %v432_v0 = vadd.f32 %v431_v61, %v430_v58 }
  0x9d   : > { %v372_v60 = vadd.f32 %v371_v57, %v370_v55 }
  0x9e   : > { %v433_v3 = vrot.slane %v432_v0, 1 }
  0x9f   : > { %v377_v63 = vsel %vm376_vm0, %v372_v60, 1.0 }
  0xa0   : > { %v378_v1 = vadd.f32 1e-24, %v377_v63  ;;  %v434_v5 = vadd.f32 %v433_v3, %v432_v0 }
  0xa2   : > { %720 = vlog2.f32 %v378_v1  ;;  %v441_v6 = vsel %vm440_vm1, %v434_v5, 1.0 }
  0xa3   : > { %v442_v7 = vadd.f32 1e-24, %v441_v6 }
  0xa5   : > { %722 = vlog2.f32 %v442_v7 }
  0xaf   : > { %v721_v8 = vpop.eup %720 }
  0xb0   : > { %v380_v9 = vmul.f32 0.6931472, %v721_v8 }
  0xb2   : > { %v381_v10 = vsub.f32 0.0, %v380_v9  ;;  %v723_v11 = vpop.eup %722 }
  0xb3   : > { %v444_v12 = vmul.f32 0.6931472, %v723_v11 }
  0xb5   : > { %v445_v4 = vsub.f32 %v381_v10, %v444_v12 }
  0xb7   : > { %v447_v14 = vadd.f32 %v446_v13, %v445_v4 }
  0xb9   : > { %448 = vst [vmem:[#allocation2] sm:$0x1] %v447_v14 }
  0xc0   : > { %v452_v15 = vld [vmem:[#allocation2] sm:$0x1] }
  0xc1   : > { %453 = vst [vmem:[%s259_s22] sm:$0x1] %v452_v15 }
  0xc2   : > { %789 = shalt.err (!%p786_p7)
}
  0xc3   : > { %s790_s12 = scalar_lea.hbm %s465_s4, 16  ;;  %s794_s27 = scalar_lea.hbm %s1342_s2, 32 }
  0xc4   : > { %p791_p13 = scmp.ne.s32.totalorder %s465_s4, %s790_s12  ;;  %p795_p4 = scmp.lt.s32.totalorder %s465_s4, %s1342_s2 }
  0xc5   : > { %p796_p8 = scmp.lt.s32.totalorder %s794_s27, %s790_s12 }
  0xc6   : > { %p792_p1 = pnand %p791_p13, %p1064_p3 }
  0xc7   : > { %p797_p2 = por %p796_p8, %p795_p4 }
  0xc8   : > { %p793_p6 = pneg %p792_p1 }
  0xca   : > { %p798_p12 = pnand %p797_p2, %p793_p6 }
  0xcc   : > { %801 = shalt.err (!%p798_p12)
}
  0xcd   : > { %610 = dma.vmem_to_hbm [thread:$0]  (%p1064_p3), %s1278_s17, 16, %s465_s4, %s455_s15  }
  0xce PF: > { %s479_s3 = sand.u32 1, %s864_s9   ;;  %p1363_p0 = scmp.ge.s32.totalorder %s908_s20, 2 }
  0xcf   : > { %s480_s25 = scalar_lea.sflag [#allocation5], %s479_s3 }
  0xd0   : > { %p613_p5 = pnand %p1363_p0, %p1070_p11 }
  0xd2   : > { %p614_p9 = pneg %p613_p5 }
  0xd4   : > { %859 = dma.done.wait (%p614_p9), %s480_s25, 16  }
  0xd5   : > { %861 = vsyncadd (%p614_p9), %s480_s25, 4294967280  ;;  %s21_s20 = sadd.s32 1, %s908_s20   ;;  %s1364_s19 = sld [smem:[#allocation12_spill]] }
  0xd6   : > { %p18_p10 = scmp.ge.s32.totalorder %s21_s20, 4   ;;  %s1365_s11 = sld [smem:[#allocation18_spill]] }
  0xd7   : > { %s1366_s7 = sld [smem:[#allocation17_spill]]  ;;  %s1371_s9 = smov %s868_s10 }
  0xd8   : > { %s1367_s22 = sld [smem:[#allocation13_spill]]  ;;  %s1373_s12 = smov %s880_s13 }
  0xd9   : > { %s1368_s17 = sld [smem:[#allocation16_spill]]  ;;  %s1374_s13 = smov %s884_s14 }
  0xda   : > { %s1369_s18 = sld [smem:[#allocation14_spill]]  ;;  %s1376_s15 = smov %s892_s16 }
  0xdb   : > { %s1370_s24 = sld [smem:[#allocation15_spill]]  ;;  %s1372_s10 = smov %s1364_s19 }
  0xdd   : > { %s1375_s14 = smov %s1366_s7  ;;  %20 = sbr.rel (!%p18_p10) target bundleno = 11 (0xb), region = 94 }
  0xde   : > { %s1377_s16 = smov %s1367_s22 }
  0xe1   : > { %s1378_s19 = smov %s1370_s24 }
  0xe2   :  { %484 = vsyncpa [#allocation4], 1 }
  0xe3   :  { %486 = vsyncpa [#allocation4 + $0x1], 1 }
  0xe4   :  { %487 = vsyncpa [#allocation7], 1 }
  0xe5   :  { %489 = vsyncpa [#allocation7 + $0x1], 1 }
  0xe6   :  { %490 = vsyncpa [#allocation5], 1 }
  0xe7   :  { %492 = vsyncpa [#allocation5 + $0x1], 1 }

</bundles_post_ra>
